<compile_context>
chip_gen: v7x
topology: tpu7x:2x2x1
jax: 0.10.0
libtpu: 0.0.40
codegen_flags: <defaults>
</compile_context>

<pallas_src>
import jax
import jax.numpy as jnp
from jax.experimental import pallas as pl
from jax.experimental.pallas import tpu as pltpu

LANE = 128  # hidden dim is padded (once, at prep time) to a lane multiple


def _round_up(n, m):
    return ((n + m - 1) // m) * m


# ---------------------------------------------------------------------------
# Kernel: fused Linear -> ReLU -> Linear -> ReLU -> Linear on one batch tile.
# ---------------------------------------------------------------------------
def mlp_kernel(x_ref, w1_ref, b1_ref, w2_ref, b2_ref, w3_ref, b3_ref, o_ref):
    # x arrives f32 straight from HBM; the bf16 downcast happens here (VPU has
    # slack).  Matmuls use bf16 operands on the MXU with f32 accumulation;
    # bias add + ReLU stay in f32 (v5e VPU has no bf16 path).
    x = x_ref[...].astype(jnp.bfloat16)
    h1 = jnp.dot(x, w1_ref[...], preferred_element_type=jnp.float32) + b1_ref[...]
    h1 = jnp.maximum(h1, 0.0).astype(jnp.bfloat16)
    h2 = jnp.dot(h1, w2_ref[...], preferred_element_type=jnp.float32) + b2_ref[...]
    h2 = jnp.maximum(h2, 0.0).astype(jnp.bfloat16)
    y = jnp.dot(h2, w3_ref[...], preferred_element_type=jnp.float32) + b3_ref[...]
    o_ref[...] = y.astype(o_ref.dtype)


# ---------------------------------------------------------------------------
# One-time parameter prep (hoisted out of the hot forward path).
# ---------------------------------------------------------------------------
def prepare_params(params):
    """Pad the hidden dim to a lane multiple and cast weights to bf16, once.

    n_input / n_output stay native (their blocks use the full-extent last dim,
    which is always legal), so x and the output need no pad/slice passes per
    call.  Zero-padded hidden lanes stay exactly 0 through bias-add + ReLU, so
    real outputs are unchanged.
    """
    n_input, n_hidden = params["w1"].shape
    n_output = params["w3"].shape[1]
    nh = _round_up(n_hidden, LANE)
    bf = jnp.bfloat16

    w1 = jnp.zeros((n_input, nh), bf).at[:, :n_hidden].set(params["w1"].astype(bf))
    b1 = jnp.zeros((1, nh), jnp.float32).at[:, :n_hidden].set(params["b1"])
    w2 = jnp.zeros((nh, nh), bf).at[:n_hidden, :n_hidden].set(params["w2"].astype(bf))
    b2 = jnp.zeros((1, nh), jnp.float32).at[:, :n_hidden].set(params["b2"])
    w3 = jnp.zeros((nh, n_output), bf).at[:n_hidden, :].set(params["w3"].astype(bf))
    b3 = params["b3"].astype(jnp.float32)
    return dict(w1=w1, b1=b1, w2=w2, b2=b2, w3=w3, b3=b3)


# ---------------------------------------------------------------------------
# Forward: single pallas_call over batch tiles; weights stay VMEM-resident.
# ---------------------------------------------------------------------------
def bot_model_forward(x, prepped, *, bm=None):
    B, n_input = x.shape
    nh = prepped["w1"].shape[1]          # lane-padded hidden width
    n_output = prepped["w3"].shape[1]
    assert prepped["w1"].shape[0] == n_input

    # Batch-tile heuristic:
    #  * small batch: a single grid step covering the whole batch.
    #  * otherwise:   an even number of <=~1024-row steps -> amortizes the
    #    ~0.35us/step grid overhead, keeps DMA near the HBM roofline, and
    #    load-balances the "parallel" axis across v7x's 2 TensorCores
    #    (v5e/v6e single-TC are unaffected).
    if bm is None:
        if B <= 256:
            bm = max(_round_up(B, 16), 16)
        else:
            n_steps = 2 * max(1, -(-B // 2048))
            bm = _round_up(-(-B // n_steps), 16)
    grid = (pl.cdiv(B, bm),)   # ragged tail handled by partial-block masking

    # Resident weights/biases: constant index_map -> stay in VMEM every step.
    resident = lambda shape: pl.BlockSpec(shape, lambda i: (0, 0))

    # Scoped-VMEM guard: resident weights + double-buffered x/out tiles +
    # f32 intermediates.  Only raised above the default (16 MiB on v5e,
    # 32 MiB on v6e/v7x) when needed; capped at v7x's 64 MiB physical VMEM.
    weight_bytes = sum(int(prepped[k].size) * prepped[k].dtype.itemsize
                       for k in ("w1", "b1", "w2", "b2", "w3", "b3"))
    tile_bytes = 2 * bm * n_input * 4 + 2 * bm * n_output * 4 + 4 * bm * nh * 4
    est = weight_bytes + tile_bytes
    vmem_limit = int(min(64 * 2**20, est * 3 // 2)) if est > 12 * 2**20 else None
    # TODO(synk): when resident weights approach tens of MiB (v7x has only
    # 64 MiB VMEM/TC), switch to a K-tiled variant (reduction grid axis +
    # f32 accumulator scratch) instead of the all-weights-resident strategy.

    return pl.pallas_call(
        mlp_kernel,
        out_shape=jax.ShapeDtypeStruct((B, n_output), jnp.float32),
        grid_spec=pl.GridSpec(
            grid=grid,
            in_specs=[
                pl.BlockSpec((bm, n_input), lambda i: (i, 0)),   # x: streamed
                resident((n_input, nh)),
                resident((1, nh)),
                resident((nh, nh)),
                resident((1, nh)),
                resident((nh, n_output)),
                resident((1, n_output)),
            ],
            out_specs=pl.BlockSpec((bm, n_output), lambda i: (i, 0)),
        ),
        compiler_params=pltpu.CompilerParams(
            dimension_semantics=("parallel",),
            vmem_limit_bytes=vmem_limit,
        ),
    )(x, prepped["w1"], prepped["b1"], prepped["w2"], prepped["b2"],
      prepped["w3"], prepped["b3"])


# ---------------------------------------------------------------------------
# Init + references (for the self-check in __main__).
# ---------------------------------------------------------------------------
def init_params(key, n_input, n_hidden, n_output):
    """Deterministic init mimicking nn.Linear's U(-1/sqrt(fan_in), 1/sqrt(fan_in))."""
    def linear_init(k, fan_in, fan_out):
        kw, kb = jax.random.split(k)
        bound = 1.0 / jnp.sqrt(fan_in)
        w = jax.random.uniform(kw, (fan_in, fan_out), jnp.float32, -bound, bound)
        b = jax.random.uniform(kb, (1, fan_out), jnp.float32, -bound, bound)
        return w, b

    k1, k2, k3 = jax.random.split(key, 3)
    w1, b1 = linear_init(k1, n_input, n_hidden)
    w2, b2 = linear_init(k2, n_hidden, n_hidden)
    w3, b3 = linear_init(k3, n_hidden, n_output)
    return dict(w1=w1, b1=b1, w2=w2, b2=b2, w3=w3, b3=b3)


def reference_forward_f32(x, p):
    h1 = jnp.maximum(x @ p["w1"] + p["b1"], 0.0)
    h2 = jnp.maximum(h1 @ p["w2"] + p["b2"], 0.0)
    return h2 @ p["w3"] + p["b3"]


def reference_forward_bf16(x, p):
    # Same mixed-precision recipe as the kernel (bf16 operands, f32 accum).
    bf = jnp.bfloat16
    h1 = jnp.dot(x.astype(bf), p["w1"].astype(bf),
                 preferred_element_type=jnp.float32) + p["b1"]
    h1 = jnp.maximum(h1, 0.0)
    h2 = jnp.dot(h1.astype(bf), p["w2"].astype(bf),
                 preferred_element_type=jnp.float32) + p["b2"]
    h2 = jnp.maximum(h2, 0.0)
    return jnp.dot(h2.astype(bf), p["w3"].astype(bf),
                   preferred_element_type=jnp.float32) + p["b3"]


if __name__ == "__main__":
    key = jax.random.PRNGKey(0)
    kx, kp = jax.random.split(key)

    B, n_input, n_hidden, n_output = 16, 32, 64, 16
    x = jax.random.normal(kx, (B, n_input), jnp.float32)
    params = init_params(kp, n_input, n_hidden, n_output)

    prepped = prepare_params(params)   # one-time prep, out of the hot path
    out = bot_model_forward(x, prepped)
    out = jax.block_until_ready(out)
    assert out.shape == (B, n_output)
    assert out.dtype == jnp.float32

    # Exact-recipe check (bf16 operands, f32 accumulation) — tight tolerance.
    ref_bf16 = reference_forward_bf16(x, params)
    assert jnp.allclose(out, ref_bf16, atol=1e-4, rtol=1e-4), "mismatch vs bf16 reference"

    # Semantics sanity check vs. the pure-f32 PyTorch-equivalent forward.
    # (bf16 MXU operands trade a small numeric delta for ~3x MXU throughput.)
    ref_f32 = reference_forward_f32(x, params)
    assert jnp.allclose(out, ref_f32, atol=5e-2, rtol=5e-2), "mismatch vs f32 reference"

    print("KERNEL_OK")
</pallas_src>

<mosaic_0001>
module attributes {stable_mosaic.version = 11 : i64} {
  func.func @mlp_kernel(%arg0: i32, %arg1: memref<16x32xf32, #tpu.memory_space<vmem>>, %arg2: memref<32x128xbf16, #tpu.memory_space<vmem>>, %arg3: memref<1x128xf32, #tpu.memory_space<vmem>>, %arg4: memref<128x128xbf16, #tpu.memory_space<vmem>>, %arg5: memref<1x128xf32, #tpu.memory_space<vmem>>, %arg6: memref<128x16xbf16, #tpu.memory_space<vmem>>, %arg7: memref<1x16xf32, #tpu.memory_space<vmem>>, %arg8: memref<16x16xf32, #tpu.memory_space<vmem>>) attributes {dimension_semantics = [#tpu.dimension_semantics<parallel>], iteration_bounds = array<i64: 1>, scalar_prefetch = 0 : i64, scratch_operands = 0 : i64, tpu.core_type = #tpu.core_type<tc>, window_params = [{transform_indices = @transform_0, window_bounds = array<i64: 16, 32>}, {pipeline_mode = #tpu.pipeline_mode<synchronous>, transform_indices = @transform_1, window_bounds = array<i64: 32, 128>}, {pipeline_mode = #tpu.pipeline_mode<synchronous>, transform_indices = @transform_2, window_bounds = array<i64: 1, 128>}, {pipeline_mode = #tpu.pipeline_mode<synchronous>, transform_indices = @transform_3, window_bounds = array<i64: 128, 128>}, {pipeline_mode = #tpu.pipeline_mode<synchronous>, transform_indices = @transform_4, window_bounds = array<i64: 1, 128>}, {pipeline_mode = #tpu.pipeline_mode<synchronous>, transform_indices = @transform_5, window_bounds = array<i64: 128, 16>}, {pipeline_mode = #tpu.pipeline_mode<synchronous>, transform_indices = @transform_6, window_bounds = array<i64: 1, 16>}, {transform_indices = @transform_7, window_bounds = array<i64: 16, 16>}]} {
    %c0 = arith.constant 0 : index
    %c0_0 = arith.constant 0 : index
    %0 = vector.load %arg1[%c0, %c0_0] : memref<16x32xf32, #tpu.memory_space<vmem>>, vector<16x32xf32>
    %1 = arith.truncf %0 : vector<16x32xf32> to vector<16x32xbf16>
    %c0_1 = arith.constant 0 : index
    %c0_2 = arith.constant 0 : index
    %2 = vector.load %arg2[%c0_1, %c0_2] : memref<32x128xbf16, #tpu.memory_space<vmem>>, vector<32x128xbf16>
    %cst = arith.constant dense<0.000000e+00> : vector<16x128xf32>
    %3 = tpu.matmul %1, %2, %cst {dimension_numbers = #tpu.dot_dimension_numbers<[1], [0], [0], [1], [0, 0, 1, 1], [], []>} : vector<16x32xbf16>, vector<32x128xbf16>, vector<16x128xf32> -> vector<16x128xf32>
    %c0_3 = arith.constant 0 : index
    %c0_4 = arith.constant 0 : index
    %4 = vector.load %arg3[%c0_3, %c0_4] : memref<1x128xf32, #tpu.memory_space<vmem>>, vector<1x128xf32>
    %5 = vector.broadcast %4 : vector<1x128xf32> to vector<16x128xf32>
    %6 = arith.addf %3, %5 : vector<16x128xf32>
    %cst_5 = arith.constant 0.000000e+00 : f32
    %7 = vector.broadcast %cst_5 : f32 to vector<16x128xf32>
    %8 = arith.maximumf %6, %7 : vector<16x128xf32>
    %9 = arith.truncf %8 : vector<16x128xf32> to vector<16x128xbf16>
    %c0_6 = arith.constant 0 : index
    %c0_7 = arith.constant 0 : index
    %10 = vector.load %arg4[%c0_6, %c0_7] : memref<128x128xbf16, #tpu.memory_space<vmem>>, vector<128x128xbf16>
    %cst_8 = arith.constant dense<0.000000e+00> : vector<16x128xf32>
    %11 = tpu.matmul %9, %10, %cst_8 {dimension_numbers = #tpu.dot_dimension_numbers<[1], [0], [0], [1], [0, 0, 1, 1], [], []>} : vector<16x128xbf16>, vector<128x128xbf16>, vector<16x128xf32> -> vector<16x128xf32>
    %c0_9 = arith.constant 0 : index
    %c0_10 = arith.constant 0 : index
    %12 = vector.load %arg5[%c0_9, %c0_10] : memref<1x128xf32, #tpu.memory_space<vmem>>, vector<1x128xf32>
    %13 = vector.broadcast %12 : vector<1x128xf32> to vector<16x128xf32>
    %14 = arith.addf %11, %13 : vector<16x128xf32>
    %cst_11 = arith.constant 0.000000e+00 : f32
    %15 = vector.broadcast %cst_11 : f32 to vector<16x128xf32>
    %16 = arith.maximumf %14, %15 : vector<16x128xf32>
    %17 = arith.truncf %16 : vector<16x128xf32> to vector<16x128xbf16>
    %c0_12 = arith.constant 0 : index
    %c0_13 = arith.constant 0 : index
    %18 = vector.load %arg6[%c0_12, %c0_13] : memref<128x16xbf16, #tpu.memory_space<vmem>>, vector<128x16xbf16>
    %cst_14 = arith.constant dense<0.000000e+00> : vector<16x16xf32>
    %19 = tpu.matmul %17, %18, %cst_14 {dimension_numbers = #tpu.dot_dimension_numbers<[1], [0], [0], [1], [0, 0, 1, 1], [], []>} : vector<16x128xbf16>, vector<128x16xbf16>, vector<16x16xf32> -> vector<16x16xf32>
    %c0_15 = arith.constant 0 : index
    %c0_16 = arith.constant 0 : index
    %20 = vector.load %arg7[%c0_15, %c0_16] : memref<1x16xf32, #tpu.memory_space<vmem>>, vector<1x16xf32>
    %21 = vector.broadcast %20 : vector<1x16xf32> to vector<16x16xf32>
    %22 = arith.addf %19, %21 : vector<16x16xf32>
    %c0_17 = arith.constant 0 : index
    %c0_18 = arith.constant 0 : index
    %23 = vector.load %arg8[%c0_17, %c0_18] : memref<16x16xf32, #tpu.memory_space<vmem>>, vector<16x16xf32>
    tpu.vector_store %arg8[%c0_17, %c0_18], %22 {strides = array<i32>} : memref<16x16xf32, #tpu.memory_space<vmem>>, vector<16x16xf32>,
    return
  }
  func.func @transform_0(%arg0: i32) -> (i32, i32) {
    %c0_i32 = arith.constant 0 : i32
    %c0_i32_0 = arith.constant 0 : i32
    return %arg0, %c0_i32 : i32, i32
  }
  func.func @transform_1(%arg0: i32) -> (i32, i32) {
    %c0_i32 = arith.constant 0 : i32
    %c0_i32_0 = arith.constant 0 : i32
    %c0_i32_1 = arith.constant 0 : i32
    return %c0_i32, %c0_i32_0 : i32, i32
  }
  func.func @transform_2(%arg0: i32) -> (i32, i32) {
    %c0_i32 = arith.constant 0 : i32
    %c0_i32_0 = arith.constant 0 : i32
    %c0_i32_1 = arith.constant 0 : i32
    return %c0_i32, %c0_i32_0 : i32, i32
  }
  func.func @transform_3(%arg0: i32) -> (i32, i32) {
    %c0_i32 = arith.constant 0 : i32
    %c0_i32_0 = arith.constant 0 : i32
    %c0_i32_1 = arith.constant 0 : i32
    return %c0_i32, %c0_i32_0 : i32, i32
  }
  func.func @transform_4(%arg0: i32) -> (i32, i32) {
    %c0_i32 = arith.constant 0 : i32
    %c0_i32_0 = arith.constant 0 : i32
    %c0_i32_1 = arith.constant 0 : i32
    return %c0_i32, %c0_i32_0 : i32, i32
  }
  func.func @transform_5(%arg0: i32) -> (i32, i32) {
    %c0_i32 = arith.constant 0 : i32
    %c0_i32_0 = arith.constant 0 : i32
    %c0_i32_1 = arith.constant 0 : i32
    return %c0_i32, %c0_i32_0 : i32, i32
  }
  func.func @transform_6(%arg0: i32) -> (i32, i32) {
    %c0_i32 = arith.constant 0 : i32
    %c0_i32_0 = arith.constant 0 : i32
    %c0_i32_1 = arith.constant 0 : i32
    return %c0_i32, %c0_i32_0 : i32, i32
  }
  func.func @transform_7(%arg0: i32) -> (i32, i32) {
    %c0_i32 = arith.constant 0 : i32
    %c0_i32_0 = arith.constant 0 : i32
    return %arg0, %c0_i32 : i32, i32
  }
}

</mosaic_0001>

<bundles_post_ra>
// kernel: tpu_custom_call.1
= control target key start
LH: loop header
LB: loop body
LE: loop exit
PB: predicated region body
PF: predicated region fallthrough
CT: control target
= control target key end

     0   :  { %12 = vsyncpa [#allocation3], 0  ;;  %s687_s0 = inlined_call_operand.vmem [shape: f32[16,32], index: 0, kind: input, shape index: {}]   ;;  %s688_s1 = inlined_call_operand.hbm [shape: bf16[32,128], index: 1, kind: input, shape index: {}]   ;;  %s689_s2 = inlined_call_operand.vmem [shape: f32[1,128], index: 2, kind: input, shape index: {}]   ;;  %s690_s3 = inlined_call_operand.vmem [shape: bf16[128,128], index: 3, kind: input, shape index: {}]   ;;  %s691_s4 = inlined_call_operand.vmem [shape: f32[1,128], index: 4, kind: input, shape index: {}]   ;;  %s692_s5 = inlined_call_operand.vmem [shape: bf16[128,16], index: 5, kind: input, shape index: {}]   ;;  %s693_s6 = inlined_call_operand.vmem [shape: f32[1,16], index: 6, kind: input, shape index: {}]   ;;  %s694_s7 = inlined_call_operand.hbm [shape: f32[16,16], index: 7, kind: output, shape index: {}]  }
   0x1   :  { %13 = vsyncpa [#allocation4], 0  ;;  %s528_s24 = smov [#allocation2]   ;;  %s480_s28 = scalar_lea.hbm %s688_s1, 256 }
   0x2   :  { %s21_s25 = sshll.u32 %s528_s24, 4  ;;  %p481_p0 = scmp.ne.s32.totalorder %s688_s1, %s480_s28  ;;  %s22_s25 = int_to_ptr.vmem [resolvable:$true] %s21_s25 }
   0x3   :  { %p484_p1 = scmp.lt.u32.totalorder %s480_s28, %s688_s1 }
   0x5   :  { %p486_p2 = pnand %p484_p1, %p481_p0 }
   0x7   :  { %489 = shalt.err (!%p486_p2)
}
   0x8   :  { %s490_s10 = scalar_lea.vmem %s22_s25, 256  ;;  %p495_p4 = scmp.lt.s32.totalorder %s22_s25, %s22_s25 }
   0x9   :  { %p491_p3 = scmp.ne.s32.totalorder %s22_s25, %s490_s10  ;;  %p496_p5 = scmp.lt.s32.totalorder %s490_s10, %s490_s10 }
   0xb   :  { %p497_p6 = por %p496_p5, %p495_p4 }
   0xd   :  { %p498_p7 = pnand %p497_p6, %p491_p3 }
   0xf   :  { %501 = shalt.err (!%p498_p7)
}
  0x10   :  { %s529_s11 = smov 64   ;;  %s530_s12 = smov 4  }
  0x11   :  { %27 = dma.hbm_to_vmem [thread:$0]  %s688_s1, 256, %s22_s25, [#allocation3], %s529_s11, %s529_s11, %s530_s12  }
  0x12   :  { %524 = dma.done.wait [#allocation3], 256  }
  0x13   :  { %525 = vsyncadd [#allocation3], 4294967040  ;;  %v531_v0 = vmov 0.0   ;;  %vm532_vm0 = vmmov 0   ;;  %v462_v1 = vld [vmem:[#allocation2] sm:$0xff]   ;;  %v463_v2 = vld [vmem:[#allocation2 + $0x8] sm:$0xff]  }
  0x14   :  { %406 = vmatprep.subr.bf16.mxu0 %v531_v0  ;;  %410 = vmatprep.mubr.msk.bf16.mxu0 %vm532_vm0, %v531_v0  ;;  %v42_v3 = vld [vmem:[%s687_s0] sm:$0xff]  ;;  %v43_v4 = vld [vmem:[%s687_s0 + $0x8] sm:$0xff]  ;;  %vm68_vm1 = vcmask 261120   ;;  %v466_v8 = vld [vmem:[%s690_s3 + $0x10] sm:$0xff]   ;;  %vm343_vm2 = vcmask 130048  }
  0x15   :  { %414 = vmatprep.subr.bf16.mxu1 %v531_v0  ;;  %430 = vmatprep.mubr.msk.bf16.mxu1 %vm532_vm0, %v531_v0  ;;  %v464_v5 = vld [vmem:[%s690_s3] sm:$0xff]   ;;  %v44_v6 = vpack.c.bf16 %v43_v4, %v42_v3  ;;  %v465_v7 = vld [vmem:[%s690_s3 + $0x8] sm:$0xff]   ;;  %v467_v9 = vld [vmem:[%s690_s3 + $0x18] sm:$0xff]  }
  0x16   :  { %407 = vmatpush3.bf16.msra.mxu0 %v462_v1  ;;  %415 = vmatpush3.bf16.msra.mxu1 %v464_v5  ;;  %v468_v10 = vld [vmem:[%s690_s3 + $0x20] sm:$0xff]   ;;  %v469_v11 = vld [vmem:[%s690_s3 + $0x28] sm:$0xff]   ;;  %v470_v12 = vld [vmem:[%s690_s3 + $0x30] sm:$0xff]  }
  0x17   :  { %408 = vmatprep.subr.bf16.mxu0 %v531_v0  ;;  %416 = vmatprep.subr.bf16.mxu1 %v531_v0  ;;  %v471_v13 = vld [vmem:[%s690_s3 + $0x38] sm:$0xff]   ;;  %v472_v14 = vld [vmem:[%s692_s5] sm:$0xff]   ;;  %v473_v15 = vld [vmem:[%s692_s5 + $0x8] sm:$0xff]  }
  0x18   :  { %v474_v16 = vld [vmem:[%s692_s5 + $0x10] sm:$0xff]   ;;  %v475_v17 = vld [vmem:[%s692_s5 + $0x18] sm:$0xff]   ;;  %v476_v18 = vld [vmem:[%s692_s5 + $0x20] sm:$0xff]  }
  0x19   :  { %v477_v19 = vld [vmem:[%s692_s5 + $0x28] sm:$0xff]   ;;  %v363_v20 = vld [vmem:[%s689_s2] ss:$0 sm:$0xff]  ;;  %v478_v30 = vld [vmem:[%s692_s5 + $0x30] sm:$0xff]  }
  0x1a   :  { %409 = vmatpush3.bf16.msra.mxu0 %v463_v2  ;;  %417 = vmatpush3.bf16.msra.mxu1 %v465_v7  ;;  %v479_v31 = vld [vmem:[%s692_s5 + $0x38] sm:$0xff]   ;;  %v367_v32 = vld [vmem:[%s691_s4] ss:$0 sm:$0xff]  ;;  %s533_s5 = smov [#allocation5]  }
  0x1b   :  { %434 = vmatprep.subr.bf16.mxu0 %v531_v0  ;;  %418 = vmatprep.subr.bf16.mxu1 %v531_v0  ;;  %v376_v42 = vld [vmem:[%s693_s6] ss:$0 sm:$0xff]  ;;  %s351_s28 = sshll.u32 %s533_s5, 4  ;;  %s352_s28 = int_to_ptr.vmem [resolvable:$true] %s351_s28 }
  0x1c   :  { %s502_s4 = scalar_lea.vmem %s352_s28, 256  ;;  %p507_p9 = scmp.lt.s32.totalorder %s352_s28, %s352_s28 }
  0x1d   :  { %411 = vmatmul.mubr.msk.bf16.vlgmr.msra.gmra.mrb[0].mxu0 %vm68_vm1, %v44_v6  ;;  %p503_p8 = scmp.ne.s32.totalorder %s352_s28, %s502_s4  ;;  %p508_p10 = scmp.lt.s32.totalorder %s502_s4, %s502_s4 }
  0x1e   :  { %450 = vmatprep.mubr.msk.bf16.mxu0 %vm532_vm0, %v531_v0  ;;  %419 = vmatpush3.bf16.msra.mxu1 %v466_v8 }
  0x1f   :  { %420 = vmatprep.subr.bf16.mxu1 %v531_v0  ;;  %435 = vmatpush3.bf16.msra.mxu0 %v472_v14  ;;  %p509_p11 = por %p508_p10, %p507_p9 }
  0x20   :  { %436 = vmatprep.subr.bf16.mxu0 %v531_v0 }
  0x21   :  { %p510_p12 = pnand %p509_p11, %p503_p8 }
  0x22   :  { %421 = vmatpush3.bf16.msra.mxu1 %v467_v9 }
  0x23   :  { %422 = vmatprep.subr.bf16.mxu1 %v531_v0  ;;  %437 = vmatpush3.bf16.msra.mxu0 %v473_v15 }
  0x24   :  { %438 = vmatprep.subr.bf16.mxu0 %v531_v0 }
  0x26   :  { %423 = vmatpush3.bf16.msra.mxu1 %v468_v10 }
  0x27   :  { %424 = vmatprep.subr.bf16.mxu1 %v531_v0  ;;  %439 = vmatpush3.bf16.msra.mxu0 %v474_v16 }
  0x28   :  { %440 = vmatprep.subr.bf16.mxu0 %v531_v0 }
  0x2a   :  { %425 = vmatpush3.bf16.msra.mxu1 %v469_v11 }
  0x2b   :  { %426 = vmatprep.subr.bf16.mxu1 %v531_v0  ;;  %441 = vmatpush3.bf16.msra.mxu0 %v475_v17 }
  0x2c   :  { %442 = vmatprep.subr.bf16.mxu0 %v531_v0 }
  0x2e   :  { %427 = vmatpush3.bf16.msra.mxu1 %v470_v12 }
  0x2f   :  { %428 = vmatprep.subr.bf16.mxu1 %v531_v0  ;;  %443 = vmatpush3.bf16.msra.mxu0 %v476_v18 }
  0x30   :  { %444 = vmatprep.subr.bf16.mxu0 %v531_v0 }
  0x32   :  { %429 = vmatpush3.bf16.msra.mxu1 %v471_v13 }
  0x33   :  { %445 = vmatpush3.bf16.msra.mxu0 %v477_v19 }
  0x34   :  { %446 = vmatprep.subr.bf16.mxu0 %v531_v0 }
  0x37   :  { %447 = vmatpush3.bf16.msra.mxu0 %v478_v30 }
  0x38   :  { %448 = vmatprep.subr.bf16.mxu0 %v531_v0 }
  0x3b   :  { %449 = vmatpush3.bf16.msra.mxu0 %v479_v31 }
  0xf0   :  { %v106_v21 = vpop.f32.mrb[0].mxu0 }
  0xf1   :  { %v107_v22 = vadd.f32 %v363_v20, %v106_v21  ;;  %v412_v23 = vpop.f32.mrb[1].mxu0 }
  0xf2   :  { %v109_v24 = vpop.f32.mrb[2].mxu0 }
  0xf3   :  { %v110_v25 = vadd.f32 %v363_v20, %v109_v24  ;;  %v413_v26 = vpop.f32.mrb[3].mxu0  ;;  %v113_v27 = vmax.f32 %v107_v22, 0.0 }
  0xf5   :  { %v114_v28 = vmax.f32 %v110_v25, 0.0 }
  0xf7   :  { %v115_v29 = vpack.c.bf16 %v114_v28, %v113_v27 }
  0xf9   :  { %431 = vmatmul.mubr.bf16.vlgmr.msra.gmra.mrb[0].mxu1 %v115_v29 }
 0x1cc   :  { %v221_v33 = vpop.f32.mrb[0].mxu1 }
 0x1cd   :  { %v222_v34 = vadd.f32 %v367_v32, %v221_v33  ;;  %v432_v35 = vpop.f32.mrb[1].mxu1 }
 0x1ce   :  { %v224_v36 = vpop.f32.mrb[2].mxu1 }
 0x1cf   :  { %v225_v37 = vadd.f32 %v367_v32, %v224_v36  ;;  %v433_v38 = vpop.f32.mrb[3].mxu1  ;;  %v228_v39 = vmax.f32 %v222_v34, 0.0 }
 0x1d1   :  { %v229_v40 = vmax.f32 %v225_v37, 0.0 }
 0x1d3   :  { %v230_v41 = vpack.c.bf16 %v229_v40, %v228_v39 }
 0x1d5   :  { %451 = vmatmul.mubr.bf16.vlgmr.msra.gmra.mrb[4].mxu0 %v230_v41 }
 0x2a8   :  { %v336_v43 = vpop.f32.mrb[4].mxu0 }
 0x2a9   :  { %v337_v44 = vadd.f32 %v376_v42, %v336_v43  ;;  %v452_v45 = vpop.f32.mrb[5].mxu0 }
 0x2aa   :  { %v339_v46 = vpop.f32.mrb[6].mxu0 }
 0x2ab   :  { %344 = vst.msk [vmem:[#allocation5] sm:$0xff] %vm343_vm2, %v337_v44  ;;  %v340_v47 = vadd.f32 %v376_v42, %v339_v46  ;;  %v453_v48 = vpop.f32.mrb[7].mxu0 }
 0x2ad   :  { %345 = vst.msk [vmem:[#allocation5 + $0x8] sm:$0xff] %vm343_vm2, %v340_v47 }
 0x2ae   :  { %513 = shalt.err (!%p510_p12)
}
 0x2af   :  { %s514_s30 = scalar_lea.hbm %s694_s7, 256 }
 0x2b0   :  { %p515_p13 = scmp.ne.s32.totalorder %s694_s7, %s514_s30  ;;  %p518_p0 = scmp.lt.u32.totalorder %s514_s30, %s694_s7 }
 0x2b2   :  { %p520_p1 = pnand %p518_p0, %p515_p13 }
 0x2b4   :  { %523 = shalt.err (!%p520_p1)
}
 0x2b5   :  { %s534_s12 = smov 128   ;;  %s535_s13 = smov 8  }
 0x2b6   :  { %357 = dma.vmem_to_hbm [thread:$0]  %s352_s28, 256, %s694_s7, [#allocation4], %s534_s12, %s534_s12, %s535_s13  }
 0x2b7   :  { %526 = dma.done.wait [#allocation4], 256  }
 0x2b8   :  { %527 = vsyncadd [#allocation4], 4294967040 }
 0x2b9   :  { %361 = vsyncpa [#allocation3], 1 }
 0x2ba   :  { %362 = vsyncpa [#allocation4], 1 }

</bundles_post_ra>
